<compile_context>
chip_gen: v7x
topology: tpu7x:2x2x1
jax: 0.10.0
libtpu: 0.0.40
codegen_flags: <defaults>
</compile_context>

<pallas_src>
import functools

import numpy as np
import jax
import jax.numpy as jnp
from jax.experimental import pallas as pl
from jax.experimental.pallas import tpu as pltpu


def _round_up(a, b):
    return -(-a // b) * b


# ----------------------------------------------------------------------------
# Kernel 1: hidden MLP (fc1 -> bn1 -> fc2 -> fc3 -> bn3 -> +residual).
# Single grid step; all operands are small and fully VMEM resident.
# ----------------------------------------------------------------------------
def _hidden_mlp_kernel(x_ref, w1_ref, w2_ref, w3_ref, vec_ref, b2_ref, h_ref):
    x = x_ref[...]                                        # (Bp, L*E) bf16
    vec = vec_ref[...]                                    # (8, H) f32
    b1, s1, t1 = vec[0:1], vec[1:2], vec[2:3]
    b3, s3, t3 = vec[3:4], vec[4:5], vec[5:6]

    # fc1 -> relu (f32 accumulate)
    r1 = jnp.maximum(
        jnp.dot(x, w1_ref[...], preferred_element_type=jnp.float32) + b1, 0.0)
    # bn1 (eval) — applied explicitly because h1 feeds the residual; its effect
    # on fc2 is folded into w2/b2.
    h1 = r1 * s1 + t1
    # fc2 (bn1 folded in) -> relu
    r2 = jnp.maximum(
        jnp.dot(r1.astype(jnp.bfloat16), w2_ref[...],
                preferred_element_type=jnp.float32) + b2_ref[...], 0.0)
    # fc3 (bn2 folded in) -> relu
    r3 = jnp.maximum(
        jnp.dot(r2.astype(jnp.bfloat16), w3_ref[...],
                preferred_element_type=jnp.float32) + b3, 0.0)
    # bn3 (eval), dropout3 = id, residual with hidden1
    h3 = r3 * s3 + t3
    h_ref[...] = (h3 + h1).astype(h_ref.dtype)            # (Bp, H) bf16


# ----------------------------------------------------------------------------
# Kernel 2: fc4 logits — pure HBM streaming of w4, one vocab tile per grid
# step.  Tiles are independent -> "parallel" grid axis (v7x megacore).
# ----------------------------------------------------------------------------
def _logits_kernel(h_ref, w4_ref, b4_ref, out_ref):
    out_ref[...] = (
        jnp.dot(h_ref[...], w4_ref[...], preferred_element_type=jnp.float32)
        + b4_ref[...]).astype(out_ref.dtype)


# ----------------------------------------------------------------------------
# One-time parameter preparation: fuse BatchNorm (eval) into scale/shift,
# fold bn1 -> (w2, b2) and bn2 -> (w3, b3), pack small vectors, cast to bf16.
# ----------------------------------------------------------------------------
def prepare_params(params, eps=1e-5):
    f32, bf16 = jnp.float32, jnp.bfloat16

    def bn(i):
        s = params[f"bn{i}_gamma"] / jnp.sqrt(params[f"bn{i}_var"] + eps)
        t = params[f"bn{i}_beta"] - params[f"bn{i}_mean"] * s
        return s.astype(f32), t.astype(f32)

    s1, t1 = bn(1)
    s2, t2 = bn(2)
    s3, t3 = bn(3)

    w2f = s1[:, None] * params["w2"]                      # fold bn1 into fc2
    b2f = t1 @ params["w2"] + params["b2"]
    w3f = s2[:, None] * params["w3"]                      # fold bn2 into fc3
    b3f = t2 @ params["w3"] + params["b3"]

    H = params["w1"].shape[1]
    # Consolidate the H-sized per-feature vectors into one (8, H) operand:
    # rows = [b1, s1, t1, b3(folded), s3, t3, 0, 0] (padded to 8 sublanes).
    vec = jnp.zeros((8, H), f32)
    vec = vec.at[0].set(params["b1"].astype(f32))
    vec = vec.at[1].set(s1)
    vec = vec.at[2].set(t1)
    vec = vec.at[3].set(b3f.astype(f32))
    vec = vec.at[4].set(s3)
    vec = vec.at[5].set(t3)

    return {
        "embedding": params["embedding"].astype(bf16),    # gathered as bf16
        "w1": params["w1"].astype(bf16),
        "w2": w2f.astype(bf16),
        "b2": b2f.astype(f32).reshape(1, -1),
        "w3": w3f.astype(bf16),
        "vec": vec,
        "w4": params["w4"].astype(bf16),
        "b4": params["b4"].astype(f32).reshape(1, -1),
    }


@functools.partial(jax.jit, static_argnames=("vocab_tile", "out_dtype"))
def neural_lm3_forward(context, prep, *, vocab_tile=8192, out_dtype=jnp.float32):
    B, L = context.shape
    H = prep["w1"].shape[1]
    V = prep["w4"].shape[1]

    # Embedding gather + flatten: plain-JAX glue (table already bf16).
    x = jnp.take(prep["embedding"], context, axis=0).reshape(B, -1)   # (B, L*E)

    # ---------------- padding / tiling ------------------------------------
    # Batch padded to 16 rows: bf16 packs 16 sublanes per vreg.
    Bp = _round_up(B, 16)
    if Bp != B:
        x = jnp.pad(x, ((0, Bp - B), (0, 0)))

    # Balanced vocab tiles: bound padding waste to <128 lanes per tile.
    V128 = _round_up(V, 128)
    num_tiles = -(-V128 // vocab_tile)
    Vt = _round_up(-(-V128 // num_tiles), 128)
    Vp = num_tiles * Vt

    w4, b4 = prep["w4"], prep["b4"]
    if Vp != V:
        w4 = jnp.pad(w4, ((0, 0), (0, Vp - V)))
        b4 = jnp.pad(b4, ((0, 0), (0, Vp - V)))

    full = lambda i: (0, 0)

    # ---------------- kernel 1: hidden MLP (one step) ----------------------
    h = pl.pallas_call(
        _hidden_mlp_kernel,
        out_shape=jax.ShapeDtypeStruct((Bp, H), jnp.bfloat16),
        grid=(1,),
        in_specs=[
            pl.BlockSpec((Bp, x.shape[1]), full),          # x
            pl.BlockSpec(prep["w1"].shape, full),          # w1
            pl.BlockSpec(prep["w2"].shape, full),          # w2 (bn1 folded)
            pl.BlockSpec(prep["w3"].shape, full),          # w3 (bn2 folded)
            pl.BlockSpec(prep["vec"].shape, full),         # [b1,s1,t1,b3,s3,t3]
            pl.BlockSpec(prep["b2"].shape, full),          # b2
        ],
        out_specs=pl.BlockSpec((Bp, H), full),
        compiler_params=pltpu.CompilerParams(
            dimension_semantics=("arbitrary",)),
    )(x, prep["w1"], prep["w2"], prep["w3"], prep["vec"], prep["b2"])

    # ---------------- kernel 2: fc4 logits, vocab-tiled, parallel axis -----
    out_itemsize = np.dtype(out_dtype).itemsize
    # Double-buffered w4/b4/out tiles + resident hidden activation.
    vmem_need = 2 * (H * Vt * 2 + Vt * 4 + Bp * Vt * out_itemsize) + 2 * Bp * H * 2
    vmem_limit = int(min(max(vmem_need * 2, 32 << 20), 64 << 20))

    cost = pl.CostEstimate(
        flops=2 * Bp * H * Vp,
        transcendentals=0,
        bytes_accessed=H * Vp * 2 + Vp * 4 + Bp * H * 2 + Bp * Vp * out_itemsize,
    )

    logits = pl.pallas_call(
        _logits_kernel,
        out_shape=jax.ShapeDtypeStruct((Bp, Vp), out_dtype),
        grid=(num_tiles,),
        in_specs=[
            pl.BlockSpec((Bp, H), lambda j: (0, 0)),       # h (VMEM resident)
            pl.BlockSpec((H, Vt), lambda j: (0, j)),       # w4 vocab tile
            pl.BlockSpec((1, Vt), lambda j: (0, j)),       # b4 vocab tile
        ],
        out_specs=pl.BlockSpec((Bp, Vt), lambda j: (0, j)),
        compiler_params=pltpu.CompilerParams(
            dimension_semantics=("parallel",),             # v7x: shard both TCs
            vmem_limit_bytes=vmem_limit),
        cost_estimate=cost,
        # NOTE: with 8-16K-wide tiles the loop is back-to-back DMA; deeper
        # buffering (pl.Buffered(3)) adds little and costs VMEM, so omitted.
    )(h, w4, b4)

    # Only pay for a slice copy when padding actually occurred.
    if Bp != B or Vp != V:
        logits = logits[:B, :V]
    return logits


# ----------------------------------------------------------------------------
# Parameter init (non-trivial BN stats so the eval-mode BN path is exercised).
# ----------------------------------------------------------------------------
def init_params(key, vocab_size, embedding_dim, hidden_dim, max_length):
    ks = jax.random.split(key, 21)
    f32 = jnp.float32
    p = {
        "embedding": jax.random.normal(ks[0], (vocab_size, embedding_dim), f32),
        # Linear weights stored as (in, out).
        "w1": jax.random.normal(ks[1], (embedding_dim * max_length, hidden_dim), f32) * 0.05,
        "b1": jax.random.normal(ks[2], (hidden_dim,), f32) * 0.05,
        "w2": jax.random.normal(ks[3], (hidden_dim, hidden_dim * 2), f32) * 0.05,
        "b2": jax.random.normal(ks[4], (hidden_dim * 2,), f32) * 0.05,
        "w3": jax.random.normal(ks[5], (hidden_dim * 2, hidden_dim), f32) * 0.05,
        "b3": jax.random.normal(ks[6], (hidden_dim,), f32) * 0.05,
        "w4": jax.random.normal(ks[7], (hidden_dim, vocab_size), f32) * 0.05,
        "b4": jax.random.normal(ks[8], (vocab_size,), f32) * 0.05,
    }
    ki = 9
    for i, dim in ((1, hidden_dim), (2, hidden_dim * 2), (3, hidden_dim)):
        p[f"bn{i}_gamma"] = 1.0 + 0.1 * jax.random.normal(ks[ki], (dim,), f32); ki += 1
        p[f"bn{i}_beta"] = 0.1 * jax.random.normal(ks[ki], (dim,), f32); ki += 1
        p[f"bn{i}_mean"] = 0.1 * jax.random.normal(ks[ki], (dim,), f32); ki += 1
        p[f"bn{i}_var"] = 1.0 + 0.1 * jnp.abs(jax.random.normal(ks[ki], (dim,), f32)); ki += 1
    return p


# ----------------------------------------------------------------------------
# References for correctness checks.
# ----------------------------------------------------------------------------
def _reference_forward_f32(context, params, eps=1e-5):
    """Pure-f32, unfolded, eval-mode reference (matches the PyTorch module)."""
    def bn(x, i):
        s = params[f"bn{i}_gamma"] / jnp.sqrt(params[f"bn{i}_var"] + eps)
        t = params[f"bn{i}_beta"] - params[f"bn{i}_mean"] * s
        return x * s + t
    emb = jnp.take(params["embedding"], context, axis=0)
    x = emb.reshape(context.shape[0], -1)
    h1 = bn(jnp.maximum(x @ params["w1"] + params["b1"], 0.0), 1)
    h2 = bn(jnp.maximum(h1 @ params["w2"] + params["b2"], 0.0), 2)
    h3 = bn(jnp.maximum(h2 @ params["w3"] + params["b3"], 0.0), 3)
    h3 = h3 + h1
    return h3 @ params["w4"] + params["b4"]


def _reference_forward_matched(context, prep):
    """Plain-JAX mirror of the exact kernel math (bf16 weights, folded BN)."""
    emb = jnp.take(prep["embedding"], context, axis=0)
    x = emb.reshape(context.shape[0], -1)                    # bf16 already
    vec = prep["vec"]
    b1, s1, t1 = vec[0:1], vec[1:2], vec[2:3]
    b3, s3, t3 = vec[3:4], vec[4:5], vec[5:6]
    dot = lambda a, b: jnp.dot(a, b, preferred_element_type=jnp.float32)
    r1 = jnp.maximum(dot(x, prep["w1"]) + b1, 0.0)
    h1 = r1 * s1 + t1
    r2 = jnp.maximum(dot(r1.astype(jnp.bfloat16), prep["w2"]) + prep["b2"], 0.0)
    r3 = jnp.maximum(dot(r2.astype(jnp.bfloat16), prep["w3"]) + b3, 0.0)
    h3 = r3 * s3 + t3
    h = (h3 + h1).astype(jnp.bfloat16)
    return dot(h, prep["w4"]) + prep["b4"]


if __name__ == "__main__":
    # Small shapes consistent with the module: vocab=1024, emb=64, hidden=128,
    # max_length=10, batch=8.
    VOCAB, EMB, HID, MAXLEN, BATCH = 1024, 64, 128, 10, 8

    key = jax.random.PRNGKey(0)
    pkey, tkey = jax.random.split(key)
    params = init_params(pkey, VOCAB, EMB, HID, MAXLEN)
    context = jax.random.randint(tkey, (BATCH, MAXLEN), 0, VOCAB, dtype=jnp.int32)

    prep = prepare_params(params)
    logits = neural_lm3_forward(context, prep)
    logits = jax.block_until_ready(logits)
    assert logits.shape == (BATCH, VOCAB)

    # 1) Tight check against a plain-JAX mirror of the kernel math.
    ref_matched = _reference_forward_matched(context, prep)
    assert jnp.allclose(logits, ref_matched, atol=2e-3, rtol=2e-3), (
        float(jnp.max(jnp.abs(logits - ref_matched))))

    # 2) Loose check against the full-f32 unfolded reference (bf16 casts are
    #    the only approximation).
    ref_f32 = _reference_forward_f32(context, params)
    assert jnp.allclose(logits, ref_f32, atol=5e-2, rtol=5e-2), (
        float(jnp.max(jnp.abs(logits - ref_f32))))

    print("KERNEL_OK")
</pallas_src>

<mosaic_0001>
module attributes {stable_mosaic.version = 11 : i64} {
  func.func @_logits_kernel(%arg0: i32, %arg1: memref<16x128xbf16, #tpu.memory_space<vmem>>, %arg2: memref<128x1024xbf16, #tpu.memory_space<vmem>>, %arg3: memref<1x1024xf32, #tpu.memory_space<vmem>>, %arg4: memref<16x1024xf32, #tpu.memory_space<vmem>>) attributes {dimension_semantics = [#tpu.dimension_semantics<parallel>], iteration_bounds = array<i64: 1>, scalar_prefetch = 0 : i64, scratch_operands = 0 : i64, tpu.core_type = #tpu.core_type<tc>, window_params = [{pipeline_mode = #tpu.pipeline_mode<synchronous>, transform_indices = @transform_0, window_bounds = array<i64: 16, 128>}, {transform_indices = @transform_1, window_bounds = array<i64: 128, 1024>}, {transform_indices = @transform_2, window_bounds = array<i64: 1, 1024>}, {transform_indices = @transform_3, window_bounds = array<i64: 16, 1024>}]} {
    %c0 = arith.constant 0 : index
    %c0_0 = arith.constant 0 : index
    %0 = vector.load %arg1[%c0, %c0_0] : memref<16x128xbf16, #tpu.memory_space<vmem>>, vector<16x128xbf16>
    %c0_1 = arith.constant 0 : index
    %c0_2 = arith.constant 0 : index
    %1 = vector.load %arg2[%c0_1, %c0_2] : memref<128x1024xbf16, #tpu.memory_space<vmem>>, vector<128x1024xbf16>
    %cst = arith.constant dense<0.000000e+00> : vector<16x1024xf32>
    %2 = tpu.matmul %0, %1, %cst {dimension_numbers = #tpu.dot_dimension_numbers<[1], [0], [0], [1], [0, 0, 1, 1], [], []>} : vector<16x128xbf16>, vector<128x1024xbf16>, vector<16x1024xf32> -> vector<16x1024xf32>
    %c0_3 = arith.constant 0 : index
    %c0_4 = arith.constant 0 : index
    %3 = vector.load %arg3[%c0_3, %c0_4] : memref<1x1024xf32, #tpu.memory_space<vmem>>, vector<1x1024xf32>
    %4 = vector.broadcast %3 : vector<1x1024xf32> to vector<16x1024xf32>
    %5 = arith.addf %2, %4 : vector<16x1024xf32>
    %c0_5 = arith.constant 0 : index
    %c0_6 = arith.constant 0 : index
    %6 = vector.load %arg4[%c0_5, %c0_6] : memref<16x1024xf32, #tpu.memory_space<vmem>>, vector<16x1024xf32>
    tpu.vector_store %arg4[%c0_5, %c0_6], %5 {strides = array<i32>} : memref<16x1024xf32, #tpu.memory_space<vmem>>, vector<16x1024xf32>,
    return
  }
  func.func @transform_0(%arg0: i32) -> (i32, i32) {
    %c0_i32 = arith.constant 0 : i32
    %c0_i32_0 = arith.constant 0 : i32
    %c0_i32_1 = arith.constant 0 : i32
    return %c0_i32, %c0_i32_0 : i32, i32
  }
  func.func @transform_1(%arg0: i32) -> (i32, i32) {
    %c0_i32 = arith.constant 0 : i32
    %c0_i32_0 = arith.constant 0 : i32
    return %c0_i32, %arg0 : i32, i32
  }
  func.func @transform_2(%arg0: i32) -> (i32, i32) {
    %c0_i32 = arith.constant 0 : i32
    %c0_i32_0 = arith.constant 0 : i32
    return %c0_i32, %arg0 : i32, i32
  }
  func.func @transform_3(%arg0: i32) -> (i32, i32) {
    %c0_i32 = arith.constant 0 : i32
    %c0_i32_0 = arith.constant 0 : i32
    return %c0_i32, %arg0 : i32, i32
  }
}

module attributes {stable_mosaic.version = 11 : i64} {
  func.func @_hidden_mlp_kernel(%arg0: i32, %arg1: memref<16x640xbf16, #tpu.memory_space<vmem>>, %arg2: memref<640x128xbf16, #tpu.memory_space<vmem>>, %arg3: memref<128x256xbf16, #tpu.memory_space<vmem>>, %arg4: memref<256x128xbf16, #tpu.memory_space<vmem>>, %arg5: memref<8x128xf32, #tpu.memory_space<vmem>>, %arg6: memref<1x256xf32, #tpu.memory_space<vmem>>, %arg7: memref<16x128xbf16, #tpu.memory_space<vmem>>) attributes {dimension_semantics = [#tpu.dimension_semantics<arbitrary>], iteration_bounds = array<i64: 1>, scalar_prefetch = 0 : i64, scratch_operands = 0 : i64, tpu.core_type = #tpu.core_type<tc>, window_params = [{pipeline_mode = #tpu.pipeline_mode<synchronous>, transform_indices = @transform_0, window_bounds = array<i64: 16, 640>}, {pipeline_mode = #tpu.pipeline_mode<synchronous>, transform_indices = @transform_1, window_bounds = array<i64: 640, 128>}, {pipeline_mode = #tpu.pipeline_mode<synchronous>, transform_indices = @transform_2, window_bounds = array<i64: 128, 256>}, {pipeline_mode = #tpu.pipeline_mode<synchronous>, transform_indices = @transform_3, window_bounds = array<i64: 256, 128>}, {pipeline_mode = #tpu.pipeline_mode<synchronous>, transform_indices = @transform_4, window_bounds = array<i64: 8, 128>}, {pipeline_mode = #tpu.pipeline_mode<synchronous>, transform_indices = @transform_5, window_bounds = array<i64: 1, 256>}, {pipeline_mode = #tpu.pipeline_mode<synchronous>, transform_indices = @transform_6, window_bounds = array<i64: 16, 128>}]} {
    %c0 = arith.constant 0 : index
    %c0_0 = arith.constant 0 : index
    %0 = vector.load %arg1[%c0, %c0_0] : memref<16x640xbf16, #tpu.memory_space<vmem>>, vector<16x640xbf16>
    %c0_1 = arith.constant 0 : index
    %c0_2 = arith.constant 0 : index
    %1 = vector.load %arg5[%c0_1, %c0_2] : memref<8x128xf32, #tpu.memory_space<vmem>>, vector<8x128xf32>
    %2 = vector.extract_strided_slice %1 {offsets = [0, 0], sizes = [1, 128], strides = [1, 1]} : vector<8x128xf32> to vector<1x128xf32>
    %3 = vector.extract_strided_slice %1 {offsets = [1, 0], sizes = [1, 128], strides = [1, 1]} : vector<8x128xf32> to vector<1x128xf32>
    %4 = vector.extract_strided_slice %1 {offsets = [2, 0], sizes = [1, 128], strides = [1, 1]} : vector<8x128xf32> to vector<1x128xf32>
    %5 = vector.extract_strided_slice %1 {offsets = [3, 0], sizes = [1, 128], strides = [1, 1]} : vector<8x128xf32> to vector<1x128xf32>
    %6 = vector.extract_strided_slice %1 {offsets = [4, 0], sizes = [1, 128], strides = [1, 1]} : vector<8x128xf32> to vector<1x128xf32>
    %7 = vector.extract_strided_slice %1 {offsets = [5, 0], sizes = [1, 128], strides = [1, 1]} : vector<8x128xf32> to vector<1x128xf32>
    %c0_3 = arith.constant 0 : index
    %c0_4 = arith.constant 0 : index
    %8 = vector.load %arg2[%c0_3, %c0_4] : memref<640x128xbf16, #tpu.memory_space<vmem>>, vector<640x128xbf16>
    %cst = arith.constant dense<0.000000e+00> : vector<16x128xf32>
    %9 = tpu.matmul %0, %8, %cst {dimension_numbers = #tpu.dot_dimension_numbers<[1], [0], [0], [1], [0, 0, 1, 1], [], []>} : vector<16x640xbf16>, vector<640x128xbf16>, vector<16x128xf32> -> vector<16x128xf32>
    %10 = vector.broadcast %2 : vector<1x128xf32> to vector<16x128xf32>
    %11 = arith.addf %9, %10 : vector<16x128xf32>
    %cst_5 = arith.constant 0.000000e+00 : f32
    %12 = vector.broadcast %cst_5 : f32 to vector<16x128xf32>
    %13 = arith.maximumf %11, %12 : vector<16x128xf32>
    %14 = vector.broadcast %3 : vector<1x128xf32> to vector<16x128xf32>
    %15 = arith.mulf %13, %14 : vector<16x128xf32>
    %16 = vector.broadcast %4 : vector<1x128xf32> to vector<16x128xf32>
    %17 = arith.addf %15, %16 : vector<16x128xf32>
    %18 = arith.truncf %13 : vector<16x128xf32> to vector<16x128xbf16>
    %c0_6 = arith.constant 0 : index
    %c0_7 = arith.constant 0 : index
    %19 = vector.load %arg3[%c0_6, %c0_7] : memref<128x256xbf16, #tpu.memory_space<vmem>>, vector<128x256xbf16>
    %cst_8 = arith.constant dense<0.000000e+00> : vector<16x256xf32>
    %20 = tpu.matmul %18, %19, %cst_8 {dimension_numbers = #tpu.dot_dimension_numbers<[1], [0], [0], [1], [0, 0, 1, 1], [], []>} : vector<16x128xbf16>, vector<128x256xbf16>, vector<16x256xf32> -> vector<16x256xf32>
    %c0_9 = arith.constant 0 : index
    %c0_10 = arith.constant 0 : index
    %21 = vector.load %arg6[%c0_9, %c0_10] : memref<1x256xf32, #tpu.memory_space<vmem>>, vector<1x256xf32>
    %22 = vector.broadcast %21 : vector<1x256xf32> to vector<16x256xf32>
    %23 = arith.addf %20, %22 : vector<16x256xf32>
    %cst_11 = arith.constant 0.000000e+00 : f32
    %24 = vector.broadcast %cst_11 : f32 to vector<16x256xf32>
    %25 = arith.maximumf %23, %24 : vector<16x256xf32>
    %26 = arith.truncf %25 : vector<16x256xf32> to vector<16x256xbf16>
    %c0_12 = arith.constant 0 : index
    %c0_13 = arith.constant 0 : index
    %27 = vector.load %arg4[%c0_12, %c0_13] : memref<256x128xbf16, #tpu.memory_space<vmem>>, vector<256x128xbf16>
    %cst_14 = arith.constant dense<0.000000e+00> : vector<16x128xf32>
    %28 = tpu.matmul %26, %27, %cst_14 {dimension_numbers = #tpu.dot_dimension_numbers<[1], [0], [0], [1], [0, 0, 1, 1], [], []>} : vector<16x256xbf16>, vector<256x128xbf16>, vector<16x128xf32> -> vector<16x128xf32>
    %29 = vector.broadcast %5 : vector<1x128xf32> to vector<16x128xf32>
    %30 = arith.addf %28, %29 : vector<16x128xf32>
    %cst_15 = arith.constant 0.000000e+00 : f32
    %31 = vector.broadcast %cst_15 : f32 to vector<16x128xf32>
    %32 = arith.maximumf %30, %31 : vector<16x128xf32>
    %33 = vector.broadcast %6 : vector<1x128xf32> to vector<16x128xf32>
    %34 = arith.mulf %32, %33 : vector<16x128xf32>
    %35 = vector.broadcast %7 : vector<1x128xf32> to vector<16x128xf32>
    %36 = arith.addf %34, %35 : vector<16x128xf32>
    %37 = arith.addf %36, %17 : vector<16x128xf32>
    %38 = arith.truncf %37 : vector<16x128xf32> to vector<16x128xbf16>
    %c0_16 = arith.constant 0 : index
    %c0_17 = arith.constant 0 : index
    %39 = vector.load %arg7[%c0_16, %c0_17] : memref<16x128xbf16, #tpu.memory_space<vmem>>, vector<16x128xbf16>
    tpu.vector_store %arg7[%c0_16, %c0_17], %38 {strides = array<i32>} : memref<16x128xbf16, #tpu.memory_space<vmem>>, vector<16x128xbf16>,
    return
  }
  func.func @transform_0(%arg0: i32) -> (i32, i32) {
    %c0_i32 = arith.constant 0 : i32
    %c0_i32_0 = arith.constant 0 : i32
    %c0_i32_1 = arith.constant 0 : i32
    return %c0_i32, %c0_i32_0 : i32, i32
  }
  func.func @transform_1(%arg0: i32) -> (i32, i32) {
    %c0_i32 = arith.constant 0 : i32
    %c0_i32_0 = arith.constant 0 : i32
    %c0_i32_1 = arith.constant 0 : i32
    return %c0_i32, %c0_i32_0 : i32, i32
  }
  func.func @transform_2(%arg0: i32) -> (i32, i32) {
    %c0_i32 = arith.constant 0 : i32
    %c0_i32_0 = arith.constant 0 : i32
    %c0_i32_1 = arith.constant 0 : i32
    return %c0_i32, %c0_i32_0 : i32, i32
  }
  func.func @transform_3(%arg0: i32) -> (i32, i32) {
    %c0_i32 = arith.constant 0 : i32
    %c0_i32_0 = arith.constant 0 : i32
    %c0_i32_1 = arith.constant 0 : i32
    return %c0_i32, %c0_i32_0 : i32, i32
  }
  func.func @transform_4(%arg0: i32) -> (i32, i32) {
    %c0_i32 = arith.constant 0 : i32
    %c0_i32_0 = arith.constant 0 : i32
    %c0_i32_1 = arith.constant 0 : i32
    return %c0_i32, %c0_i32_0 : i32, i32
  }
  func.func @transform_5(%arg0: i32) -> (i32, i32) {
    %c0_i32 = arith.constant 0 : i32
    %c0_i32_0 = arith.constant 0 : i32
    %c0_i32_1 = arith.constant 0 : i32
    return %c0_i32, %c0_i32_0 : i32, i32
  }
  func.func @transform_6(%arg0: i32) -> (i32, i32) {
    %c0_i32 = arith.constant 0 : i32
    %c0_i32_0 = arith.constant 0 : i32
    %c0_i32_1 = arith.constant 0 : i32
    return %c0_i32, %c0_i32_0 : i32, i32
  }
}

</mosaic_0001>

<bundles_post_ra>
// kernel: neural_lm3_forward.3
= control target key start
LH: loop header
LB: loop body
LE: loop exit
PB: predicated region body
PF: predicated region fallthrough
CT: control target
= control target key end

     0   :  { %v708_v3 = vmov 0   ;;  %s985_s1 = inlined_call_operand.vmem [shape: bf16[128,1024], index: 1, kind: input, shape index: {}]   ;;  %s986_s0 = inlined_call_operand.vmem [shape: bf16[16,128], index: 0, kind: input, shape index: {}]   ;;  %s987_s2 = inlined_call_operand.vmem [shape: f32[1,1024], index: 2, kind: input, shape index: {}]   ;;  %s988_s3 = inlined_call_operand.vmem [shape: f32[16,1024], index: 3, kind: output, shape index: {}]  }
   0x1   :  { %v17_v0 = vld [vmem:[%s985_s1] sm:$0xff]  ;;  %v18_v2 = vld [vmem:[%s985_s1 + $0x8] sm:$0xff]  ;;  %481 = vmatprep.mubr.bf16.mxu0 %v708_v3  ;;  %524 = vmatprep.mubr.bf16.mxu1 %v708_v3  ;;  %v19_v63 = vld [vmem:[%s985_s1 + $0x10] sm:$0xff] }
   0x2   :  { %v21_v1 = vld [vmem:[%s985_s1 + $0x20] sm:$0xff]  ;;  %v22_v5 = vld [vmem:[%s985_s1 + $0x28] sm:$0xff] }
   0x3   :  { %v643_v4 = vcombine.high %v17_v0, %v21_v1  ;;  %v642_v6 = vcombine.low %v17_v0, %v21_v1  ;;  %v25_v7 = vld [vmem:[%s985_s1 + $0x40] sm:$0xff]  ;;  %v645_v9 = vcombine.high %v18_v2, %v22_v5  ;;  %v644_v10 = vcombine.low %v18_v2, %v22_v5  ;;  %v26_v12 = vld [vmem:[%s985_s1 + $0x48] sm:$0xff]  ;;  %v23_v0 = vld [vmem:[%s985_s1 + $0x30] sm:$0xff] }
   0x4   :  { %v29_v8 = vld [vmem:[%s985_s1 + $0x60] sm:$0xff]  ;;  %v30_v13 = vld [vmem:[%s985_s1 + $0x68] sm:$0xff]  ;;  %v20_v1 = vld [vmem:[%s985_s1 + $0x18] sm:$0xff] }
   0x5   :  { %v651_v11 = vcombine.high %v25_v7, %v29_v8  ;;  %v33_v14 = vld [vmem:[%s985_s1 + $0x80] sm:$0xff]  ;;  %449 = vmatprep.subr.bf16.mxu0 %v643_v4  ;;  %v653_v15 = vcombine.high %v26_v12, %v30_v13  ;;  %v34_v17 = vld [vmem:[%s985_s1 + $0x88] sm:$0xff]  ;;  %492 = vmatprep.subr.bf16.mxu1 %v645_v9  ;;  %v650_v19 = vcombine.low %v25_v7, %v29_v8  ;;  %v24_v2 = vld [vmem:[%s985_s1 + $0x38] sm:$0xff] }
   0x6   :  { %v37_v16 = vld [vmem:[%s985_s1 + $0xa0] sm:$0xff]  ;;  %v38_v18 = vld [vmem:[%s985_s1 + $0xa8] sm:$0xff]  ;;  %450 = vmatpush1.bf16.msra.mxu0 %v642_v6  ;;  %493 = vmatpush1.bf16.msra.mxu1 %v644_v10  ;;  %v652_v20 = vcombine.low %v26_v12, %v30_v13  ;;  %v647_v6 = vcombine.high %v19_v63, %v23_v0  ;;  %v649_v7 = vcombine.high %v20_v1, %v24_v2  ;;  %v27_v8 = vld [vmem:[%s985_s1 + $0x50] sm:$0xff] }
   0x7   :  { %451 = vmatprep.subr.bf16.mxu0 %v651_v11  ;;  %v659_v21 = vcombine.high %v33_v14, %v37_v16  ;;  %494 = vmatprep.subr.bf16.mxu1 %v653_v15  ;;  %v661_v22 = vcombine.high %v34_v17, %v38_v18  ;;  %v41_v23 = vld [vmem:[%s985_s1 + $0xc0] sm:$0xff]  ;;  %v42_v25 = vld [vmem:[%s985_s1 + $0xc8] sm:$0xff]  ;;  %v658_v27 = vcombine.low %v33_v14, %v37_v16  ;;  %v31_v9 = vld [vmem:[%s985_s1 + $0x70] sm:$0xff] }
   0x8   :  { %v45_v24 = vld [vmem:[%s985_s1 + $0xe0] sm:$0xff]  ;;  %v46_v26 = vld [vmem:[%s985_s1 + $0xe8] sm:$0xff]  ;;  %v660_v28 = vcombine.low %v34_v17, %v38_v18  ;;  %v28_v11 = vld [vmem:[%s985_s1 + $0x58] sm:$0xff]  ;;  %v646_v13 = vcombine.low %v19_v63, %v23_v0  ;;  %v648_v14 = vcombine.low %v20_v1, %v24_v2  ;;  %v655_v15 = vcombine.high %v27_v8, %v31_v9 }
   0x9   :  { %v667_v29 = vcombine.high %v41_v23, %v45_v24  ;;  %v669_v30 = vcombine.high %v42_v25, %v46_v26  ;;  %v49_v31 = vld [vmem:[%s985_s1 + $0x100] sm:$0xff]  ;;  %v50_v33 = vld [vmem:[%s985_s1 + $0x108] sm:$0xff]  ;;  %v666_v35 = vcombine.low %v41_v23, %v45_v24  ;;  %v668_v36 = vcombine.low %v42_v25, %v46_v26  ;;  %v32_v12 = vld [vmem:[%s985_s1 + $0x78] sm:$0xff] }
   0xa   :  { %452 = vmatpush1.bf16.msra.mxu0 %v650_v19  ;;  %495 = vmatpush1.bf16.msra.mxu1 %v652_v20  ;;  %v53_v32 = vld [vmem:[%s985_s1 + $0x120] sm:$0xff]  ;;  %v54_v34 = vld [vmem:[%s985_s1 + $0x128] sm:$0xff]  ;;  %v657_v16 = vcombine.high %v28_v11, %v32_v12  ;;  %v35_v17 = vld [vmem:[%s985_s1 + $0x90] sm:$0xff]  ;;  %v83_v2 = vlaneseq }
   0xb   :  { %453 = vmatprep.subr.bf16.mxu0 %v659_v21  ;;  %496 = vmatprep.subr.bf16.mxu1 %v661_v22  ;;  %v675_v37 = vcombine.high %v49_v31, %v53_v32  ;;  %v677_v38 = vcombine.high %v50_v33, %v54_v34  ;;  %v57_v39 = vld [vmem:[%s985_s1 + $0x140] sm:$0xff]  ;;  %v58_v41 = vld [vmem:[%s985_s1 + $0x148] sm:$0xff]  ;;  %v674_v43 = vcombine.low %v49_v31, %v53_v32  ;;  %v39_v18 = vld [vmem:[%s985_s1 + $0xb0] sm:$0xff] }
   0xc   :  { %v61_v40 = vld [vmem:[%s985_s1 + $0x160] sm:$0xff]  ;;  %v62_v42 = vld [vmem:[%s985_s1 + $0x168] sm:$0xff]  ;;  %v676_v44 = vcombine.low %v50_v33, %v54_v34  ;;  %v36_v19 = vld [vmem:[%s985_s1 + $0x98] sm:$0xff]  ;;  %v654_v21 = vcombine.low %v27_v8, %v31_v9  ;;  %v656_v22 = vcombine.low %v28_v11, %v32_v12  ;;  %v663_v23 = vcombine.high %v35_v17, %v39_v18 }
   0xd   :  { %v683_v45 = vcombine.high %v57_v39, %v61_v40  ;;  %v685_v46 = vcombine.high %v58_v41, %v62_v42  ;;  %v65_v47 = vld [vmem:[%s985_s1 + $0x180] sm:$0xff]  ;;  %v66_v49 = vld [vmem:[%s985_s1 + $0x188] sm:$0xff]  ;;  %v682_v51 = vcombine.low %v57_v39, %v61_v40  ;;  %v684_v52 = vcombine.low %v58_v41, %v62_v42  ;;  %v40_v20 = vld [vmem:[%s985_s1 + $0xb8] sm:$0xff] }
   0xe   :  { %454 = vmatpush1.bf16.msra.mxu0 %v658_v27  ;;  %497 = vmatpush1.bf16.msra.mxu1 %v660_v28  ;;  %v69_v48 = vld [vmem:[%s985_s1 + $0x1a0] sm:$0xff]  ;;  %v70_v50 = vld [vmem:[%s985_s1 + $0x1a8] sm:$0xff]  ;;  %v665_v24 = vcombine.high %v36_v19, %v40_v20  ;;  %v43_v25 = vld [vmem:[%s985_s1 + $0xd0] sm:$0xff] }
   0xf   :  { %455 = vmatprep.subr.bf16.mxu0 %v667_v29  ;;  %498 = vmatprep.subr.bf16.mxu1 %v669_v30  ;;  %v691_v53 = vcombine.high %v65_v47, %v69_v48  ;;  %v693_v54 = vcombine.high %v66_v49, %v70_v50  ;;  %v73_v55 = vld [vmem:[%s985_s1 + $0x1c0] sm:$0xff]  ;;  %v74_v57 = vld [vmem:[%s985_s1 + $0x1c8] sm:$0xff]  ;;  %v690_v59 = vcombine.low %v65_v47, %v69_v48  ;;  %v47_v26 = vld [vmem:[%s985_s1 + $0xf0] sm:$0xff] }
  0x10   :  { %v77_v56 = vld [vmem:[%s985_s1 + $0x1e0] sm:$0xff]  ;;  %v78_v58 = vld [vmem:[%s985_s1 + $0x1e8] sm:$0xff]  ;;  %v692_v60 = vcombine.low %v66_v49, %v70_v50  ;;  %v44_v27 = vld [vmem:[%s985_s1 + $0xd8] sm:$0xff]  ;;  %v662_v29 = vcombine.low %v35_v17, %v39_v18  ;;  %v664_v30 = vcombine.low %v36_v19, %v40_v20  ;;  %v671_v31 = vcombine.high %v43_v25, %v47_v26 }
  0x11   :  { %v699_v61 = vcombine.high %v73_v55, %v77_v56  ;;  %v701_v62 = vcombine.high %v74_v57, %v78_v58  ;;  %v698_v4 = vcombine.low %v73_v55, %v77_v56  ;;  %v700_v5 = vcombine.low %v74_v57, %v78_v58  ;;  %v848_v10 = vld [vmem:[%s986_s0] sm:$0xff]   ;;  %v48_v28 = vld [vmem:[%s985_s1 + $0xf8] sm:$0xff]  ;;  %v51_v33 = vld [vmem:[%s985_s1 + $0x110] sm:$0xff] }
  0x12   :  { %456 = vmatpush1.bf16.msra.mxu0 %v666_v35  ;;  %499 = vmatpush1.bf16.msra.mxu1 %v668_v36  ;;  %v673_v32 = vcombine.high %v44_v27, %v48_v28  ;;  %v55_v34 = vld [vmem:[%s985_s1 + $0x130] sm:$0xff]  ;;  %v56_v35 = vld [vmem:[%s985_s1 + $0x138] sm:$0xff]  ;;  %v670_v36 = vcombine.low %v43_v25, %v47_v26 }
  0x13   :  { %457 = vmatprep.subr.bf16.mxu0 %v675_v37  ;;  %500 = vmatprep.subr.bf16.mxu1 %v677_v38  ;;  %v672_v37 = vcombine.low %v44_v27, %v48_v28  ;;  %v679_v38 = vcombine.high %v51_v33, %v55_v34  ;;  %v59_v40 = vld [vmem:[%s985_s1 + $0x150] sm:$0xff]  ;;  %v60_v42 = vld [vmem:[%s985_s1 + $0x158] sm:$0xff] }
  0x14   :  { %v63_v41 = vld [vmem:[%s985_s1 + $0x170] sm:$0xff]  ;;  %v68_v50 = vld [vmem:[%s985_s1 + $0x198] sm:$0xff] }
  0x15   :  { %v67_v48 = vld [vmem:[%s985_s1 + $0x190] sm:$0xff]  ;;  %v76_v58 = vld [vmem:[%s985_s1 + $0x1d8] sm:$0xff] }
  0x16   :  { %458 = vmatpush1.bf16.msra.mxu0 %v674_v43  ;;  %501 = vmatpush1.bf16.msra.mxu1 %v676_v44  ;;  %v64_v43 = vld [vmem:[%s985_s1 + $0x178] sm:$0xff]  ;;  %v678_v44 = vcombine.low %v51_v33, %v55_v34  ;;  %v71_v49 = vld [vmem:[%s985_s1 + $0x1b0] sm:$0xff] }
  0x17   :  { %459 = vmatprep.subr.bf16.mxu0 %v683_v45  ;;  %502 = vmatprep.subr.bf16.mxu1 %v685_v46  ;;  %v687_v46 = vcombine.high %v59_v40, %v63_v41  ;;  %v689_v47 = vcombine.high %v60_v42, %v64_v43  ;;  %v75_v56 = vld [vmem:[%s985_s1 + $0x1d0] sm:$0xff] }
  0x18   :  { %v79_v57 = vld [vmem:[%s985_s1 + $0x1f0] sm:$0xff] }
  0x19   :  { %v702_v0 = vcombine.low %v75_v56, %v79_v57 }
  0x1a   :  { %460 = vmatpush1.bf16.msra.mxu0 %v682_v51  ;;  %503 = vmatpush1.bf16.msra.mxu1 %v684_v52  ;;  %v72_v51 = vld [vmem:[%s985_s1 + $0x1b8] sm:$0xff]  ;;  %v686_v52 = vcombine.low %v59_v40, %v63_v41 }
  0x1b   :  { %461 = vmatprep.subr.bf16.mxu0 %v691_v53  ;;  %504 = vmatprep.subr.bf16.mxu1 %v693_v54  ;;  %v688_v53 = vcombine.low %v60_v42, %v64_v43  ;;  %v695_v54 = vcombine.high %v67_v48, %v71_v49  ;;  %v697_v55 = vcombine.high %v68_v50, %v72_v51 }
  0x1e   :  { %462 = vmatpush1.bf16.msra.mxu0 %v690_v59  ;;  %505 = vmatpush1.bf16.msra.mxu1 %v692_v60  ;;  %v80_v59 = vld [vmem:[%s985_s1 + $0x1f8] sm:$0xff]  ;;  %v694_v60 = vcombine.low %v67_v48, %v71_v49 }
  0x1f   :  { %463 = vmatprep.subr.bf16.mxu0 %v699_v61  ;;  %506 = vmatprep.subr.bf16.mxu1 %v701_v62  ;;  %v696_v61 = vcombine.low %v68_v50, %v72_v51  ;;  %v703_v62 = vcombine.high %v75_v56, %v79_v57  ;;  %v705_v63 = vcombine.high %v76_v58, %v80_v59 }
  0x20   :  { %v704_v1 = vcombine.low %v76_v58, %v80_v59 }
  0x22   :  { %464 = vmatpush1.bf16.msra.mxu0 %v698_v4  ;;  %507 = vmatpush1.bf16.msra.mxu1 %v700_v5  ;;  %v84_v4 = vshrl.u32 %v83_v2, 7 }
  0x23   :  { %535 = vmatprep.subr.bf16.mxu0 %v647_v6  ;;  %578 = vmatprep.subr.bf16.mxu1 %v649_v7  ;;  %v81_v6 = vld [vmem:[%s987_s2] sm:$0xff] }
  0x24   :  { %v85_v5 = vsub.s32 0, %v84_v4  ;;  %v93_v7 = vsub.s32 2, %v84_v4  ;;  %v89_v8 = vsub.s32 1, %v84_v4  ;;  %v97_v9 = vsub.s32 3, %v84_v4 }
  0x25   :  { %482 = vmatmul.mubr.bf16.vlgmr.msra.gmra.mrb[0].mxu0 %v848_v10  ;;  %525 = vmatmul.mubr.bf16.vlgmr.msra.gmra.mrb[0].mxu1 %v848_v10  ;;  %v113_v33 = vsub.s32 7, %v84_v4 }
  0x26   :  { %536 = vmatpush1.bf16.msra.mxu0 %v646_v13  ;;  %579 = vmatpush1.bf16.msra.mxu1 %v648_v14  ;;  %v86_v11 = vrot.slane %v81_v6, %v85_v5  ;;  %v94_v12 = vrot.slane %v81_v6, %v93_v7  ;;  %v90_v13 = vrot.slane %v81_v6, %v89_v8 }
  0x27   :  { %537 = vmatprep.subr.bf16.mxu0 %v655_v15  ;;  %580 = vmatprep.subr.bf16.mxu1 %v657_v16  ;;  %v98_v14 = vrot.slane %v81_v6, %v97_v9 }
  0x28   :  { %567 = vmatprep.mubr.bf16.mxu0 %v708_v3  ;;  %610 = vmatprep.mubr.bf16.mxu1 %v708_v3  ;;  %v52_v3 = vld [vmem:[%s985_s1 + $0x118] sm:$0xff] }
  0x29   :  { %v681_v39 = vcombine.high %v52_v3, %v56_v35  ;;  %v680_v45 = vcombine.low %v52_v3, %v56_v35 }
  0x2a   :  { %538 = vmatpush1.bf16.msra.mxu0 %v654_v21  ;;  %581 = vmatpush1.bf16.msra.mxu1 %v656_v22 }
  0x2b   :  { %539 = vmatprep.subr.bf16.mxu0 %v663_v23  ;;  %582 = vmatprep.subr.bf16.mxu1 %v665_v24 }
  0x2e   :  { %540 = vmatpush1.bf16.msra.mxu0 %v662_v29  ;;  %583 = vmatpush1.bf16.msra.mxu1 %v664_v30  ;;  %v101_v30 = vsub.s32 4, %v84_v4 }
  0x2f   :  { %541 = vmatprep.subr.bf16.mxu0 %v671_v31  ;;  %584 = vmatprep.subr.bf16.mxu1 %v673_v32  ;;  %v109_v31 = vsub.s32 6, %v84_v4  ;;  %v105_v32 = vsub.s32 5, %v84_v4 }
  0x30   :  { %v102_v34 = vrot.slane %v81_v6, %v101_v30 }
  0x31   :  { %v110_v3 = vrot.slane %v81_v6, %v109_v31  ;;  %v106_v35 = vrot.slane %v81_v6, %v105_v32 }
  0x32   :  { %542 = vmatpush1.bf16.msra.mxu0 %v670_v36  ;;  %585 = vmatpush1.bf16.msra.mxu1 %v672_v37  ;;  %v114_v36 = vrot.slane %v81_v6, %v113_v33 }
  0x33   :  { %543 = vmatprep.subr.bf16.mxu0 %v679_v38  ;;  %586 = vmatprep.subr.bf16.mxu1 %v681_v39 }
  0x36   :  { %544 = vmatpush1.bf16.msra.mxu0 %v678_v44  ;;  %587 = vmatpush1.bf16.msra.mxu1 %v680_v45 }
  0x37   :  { %545 = vmatprep.subr.bf16.mxu0 %v687_v46  ;;  %588 = vmatprep.subr.bf16.mxu1 %v689_v47 }
  0x3a   :  { %546 = vmatpush1.bf16.msra.mxu0 %v686_v52  ;;  %589 = vmatpush1.bf16.msra.mxu1 %v688_v53 }
  0x3b   :  { %547 = vmatprep.subr.bf16.mxu0 %v695_v54  ;;  %590 = vmatprep.subr.bf16.mxu1 %v697_v55 }
  0x3e   :  { %548 = vmatpush1.bf16.msra.mxu0 %v694_v60  ;;  %591 = vmatpush1.bf16.msra.mxu1 %v696_v61 }
  0x3f   :  { %549 = vmatprep.subr.bf16.mxu0 %v703_v62  ;;  %592 = vmatprep.subr.bf16.mxu1 %v705_v63 }
  0x42   :  { %550 = vmatpush1.bf16.msra.mxu0 %v702_v0  ;;  %593 = vmatpush1.bf16.msra.mxu1 %v704_v1 }
  0x45   :  { %568 = vmatmul.mubr.bf16.vlgmr.msra.gmra.mrb[4].mxu0 %v848_v10  ;;  %611 = vmatmul.mubr.bf16.vlgmr.msra.gmra.mrb[4].mxu1 %v848_v10 }
  0xf8   :  { %v483_v15 = vpop.f32.mrb[0].mxu0  ;;  %v526_v17 = vpop.f32.mrb[0].mxu1 }
  0xf9   :  { %v484_v16 = vadd.f32 %v483_v15, %v86_v11  ;;  %v485_v18 = vpop.f32.mrb[1].mxu0  ;;  %v527_v19 = vadd.f32 %v526_v17, %v94_v12  ;;  %v528_v20 = vpop.f32.mrb[1].mxu1 }
  0xfa   :  { %v486_v10 = vadd.f32 %v485_v18, %v90_v13  ;;  %v487_v21 = vpop.f32.mrb[2].mxu0  ;;  %v529_v22 = vadd.f32 %v528_v20, %v98_v14  ;;  %v530_v24 = vpop.f32.mrb[2].mxu1 }
  0xfb   :  { %621 = vst [vmem:[%s988_s3] sm:$0xff] %v484_v16  ;;  %v488_v23 = vadd.f32 %v487_v21, %v86_v11  ;;  %v489_v25 = vpop.f32.mrb[3].mxu0  ;;  %623 = vst [vmem:[%s988_s3 + $0x10] sm:$0xff] %v527_v19  ;;  %v531_v26 = vadd.f32 %v530_v24, %v94_v12  ;;  %v532_v28 = vpop.f32.mrb[3].mxu1 }
  0xfc   :  { %622 = vst [vmem:[%s988_s3 + $0x8] sm:$0xff] %v486_v10  ;;  %v490_v27 = vadd.f32 %v489_v25, %v90_v13  ;;  %624 = vst [vmem:[%s988_s3 + $0x18] sm:$0xff] %v529_v22  ;;  %v533_v29 = vadd.f32 %v532_v28, %v98_v14 }
  0xfd   :  { %629 = vst [vmem:[%s988_s3 + $0x40] sm:$0xff] %v488_v23  ;;  %631 = vst [vmem:[%s988_s3 + $0x50] sm:$0xff] %v531_v26 }
  0xfe   :  { %630 = vst [vmem:[%s988_s3 + $0x48] sm:$0xff] %v490_v27  ;;  %632 = vst [vmem:[%s988_s3 + $0x58] sm:$0xff] %v533_v29 }
 0x118   :  { %v569_v37 = vpop.f32.mrb[4].mxu0  ;;  %v612_v39 = vpop.f32.mrb[4].mxu1 }
 0x119   :  { %v570_v38 = vadd.f32 %v569_v37, %v102_v34  ;;  %v571_v40 = vpop.f32.mrb[5].mxu0  ;;  %v613_v41 = vadd.f32 %v612_v39, %v110_v3  ;;  %v614_v43 = vpop.f32.mrb[5].mxu1 }
 0x11a   :  { %v572_v42 = vadd.f32 %v571_v40, %v106_v35  ;;  %v573_v44 = vpop.f32.mrb[6].mxu0  ;;  %v615_v45 = vadd.f32 %v614_v43, %v114_v36  ;;  %v616_v47 = vpop.f32.mrb[6].mxu1 }
 0x11b   :  { %625 = vst [vmem:[%s988_s3 + $0x20] sm:$0xff] %v570_v38  ;;  %v574_v46 = vadd.f32 %v573_v44, %v102_v34  ;;  %v575_v48 = vpop.f32.mrb[7].mxu0  ;;  %627 = vst [vmem:[%s988_s3 + $0x30] sm:$0xff] %v613_v41  ;;  %v617_v49 = vadd.f32 %v616_v47, %v110_v3  ;;  %v618_v51 = vpop.f32.mrb[7].mxu1 }
 0x11c   :  { %626 = vst [vmem:[%s988_s3 + $0x28] sm:$0xff] %v572_v42  ;;  %v576_v50 = vadd.f32 %v575_v48, %v106_v35  ;;  %628 = vst [vmem:[%s988_s3 + $0x38] sm:$0xff] %v615_v45  ;;  %v619_v52 = vadd.f32 %v618_v51, %v114_v36 }
 0x11d   :  { %633 = vst [vmem:[%s988_s3 + $0x60] sm:$0xff] %v574_v46  ;;  %635 = vst [vmem:[%s988_s3 + $0x70] sm:$0xff] %v617_v49 }
 0x11e   :  { %634 = vst [vmem:[%s988_s3 + $0x68] sm:$0xff] %v576_v50  ;;  %636 = vst [vmem:[%s988_s3 + $0x78] sm:$0xff] %v619_v52 }

// kernel: neural_lm3_forward.2
= control target key start
LH: loop header
LB: loop body
LE: loop exit
PB: predicated region body
PF: predicated region fallthrough
CT: control target
= control target key end

     0   :  { %v1150_v33 = vmov 0.0   ;;  %vm1151_vm0 = vmmov 0   ;;  %v1152_v62 = vmov 0   ;;  %s1444_s1 = inlined_call_operand.vmem [shape: bf16[640,128], index: 1, kind: input, shape index: {}]   ;;  %s1445_s0 = inlined_call_operand.vmem [shape: bf16[16,640], index: 0, kind: input, shape index: {}]   ;;  %s1446_s2 = inlined_call_operand.vmem [shape: bf16[128,256], index: 2, kind: input, shape index: {}]   ;;  %s1447_s3 = inlined_call_operand.vmem [shape: bf16[256,128], index: 3, kind: input, shape index: {}]   ;;  %s1448_s4 = inlined_call_operand.vmem [shape: f32[8,128], index: 4, kind: input, shape index: {}]   ;;  %s1449_s5 = inlined_call_operand.vmem [shape: f32[1,256], index: 5, kind: input, shape index: {}]   ;;  %s1450_s6 = inlined_call_operand.vmem [shape: bf16[16,128], index: 6, kind: output, shape index: {}]  }
   0x1   :  { %v1063_v0 = vld [vmem:[%s1444_s1 + $0x40] sm:$0xff]   ;;  %v1067_v4 = vld [vmem:[%s1444_s1 + $0x48] sm:$0xff]   ;;  %v1071_v8 = vld [vmem:[%s1444_s1 + $0x50] sm:$0xff]  }
   0x2   :  { %v1064_v1 = vld [vmem:[%s1444_s1] sm:$0xff]   ;;  %965 = vmatprep.subr.bf16.mxu0 %v1063_v0  ;;  %v1068_v5 = vld [vmem:[%s1444_s1 + $0x8] sm:$0xff]   ;;  %v1072_v9 = vld [vmem:[%s1444_s1 + $0x10] sm:$0xff]  }
   0x3   :  { %v1065_v2 = vld [vmem:[%s1444_s1 + $0xc0] sm:$0xff]   ;;  %966 = vmatpush3.bf16.msra.mxu0 %v1064_v1  ;;  %v1069_v6 = vld [vmem:[%s1444_s1 + $0xc8] sm:$0xff]   ;;  %v1073_v10 = vld [vmem:[%s1444_s1 + $0xd0] sm:$0xff]  }
   0x4   :  { %v1066_v3 = vld [vmem:[%s1444_s1 + $0x80] sm:$0xff]   ;;  %987 = vmatprep.subr.bf16.mxu1 %v1065_v2  ;;  %967 = vmatprep.subr.bf16.mxu0 %v1067_v4  ;;  %v1070_v7 = vld [vmem:[%s1444_s1 + $0x88] sm:$0xff]   ;;  %v1074_v11 = vld [vmem:[%s1444_s1 + $0x90] sm:$0xff]  }
   0x5   :  { %988 = vmatpush3.bf16.msra.mxu1 %v1066_v3  ;;  %v1075_v12 = vld [vmem:[%s1444_s1 + $0x58] sm:$0xff]   ;;  %v1079_v16 = vld [vmem:[%s1444_s1 + $0x60] sm:$0xff]   ;;  %v1083_v20 = vld [vmem:[%s1444_s1 + $0x68] sm:$0xff]  }
   0x6   :  { %989 = vmatprep.subr.bf16.mxu1 %v1069_v6  ;;  %v1076_v13 = vld [vmem:[%s1444_s1 + $0x18] sm:$0xff]   ;;  %v1080_v17 = vld [vmem:[%s1444_s1 + $0x20] sm:$0xff]   ;;  %v1084_v21 = vld [vmem:[%s1444_s1 + $0x28] sm:$0xff]  }
   0x7   :  { %968 = vmatpush3.bf16.msra.mxu0 %v1068_v5  ;;  %v1077_v14 = vld [vmem:[%s1444_s1 + $0xd8] sm:$0xff]   ;;  %v1081_v18 = vld [vmem:[%s1444_s1 + $0xe0] sm:$0xff]   ;;  %v1085_v22 = vld [vmem:[%s1444_s1 + $0xe8] sm:$0xff]  }
   0x8   :  { %969 = vmatprep.subr.bf16.mxu0 %v1071_v8  ;;  %v1078_v15 = vld [vmem:[%s1444_s1 + $0x98] sm:$0xff]   ;;  %v1082_v19 = vld [vmem:[%s1444_s1 + $0xa0] sm:$0xff]   ;;  %v1086_v23 = vld [vmem:[%s1444_s1 + $0xa8] sm:$0xff]  }
   0x9   :  { %990 = vmatpush3.bf16.msra.mxu1 %v1070_v7  ;;  %v1087_v24 = vld [vmem:[%s1444_s1 + $0x70] sm:$0xff]   ;;  %v1091_v28 = vld [vmem:[%s1444_s1 + $0x78] sm:$0xff]   ;;  %v1100_v36 = vld [vmem:[%s1445_s0 + $0xc] ss:$20 sps:$4 sm:$0xff]  }
   0xa   :  { %991 = vmatprep.subr.bf16.mxu1 %v1073_v10  ;;  %v1088_v25 = vld [vmem:[%s1444_s1 + $0x30] sm:$0xff]   ;;  %v1092_v29 = vld [vmem:[%s1444_s1 + $0x38] sm:$0xff]   ;;  %v1101_v37 = vld [vmem:[%s1444_s1 + $0x100] sm:$0xff]   ;;  %454 = vmatprep.mubr.bf16.mxu1 %v1100_v36  ;;  %v111_v10 = vlaneseq }
   0xb   :  { %970 = vmatpush3.bf16.msra.mxu0 %v1072_v9  ;;  %v1089_v26 = vld [vmem:[%s1444_s1 + $0xf0] sm:$0xff]   ;;  %v1093_v30 = vld [vmem:[%s1444_s1 + $0xf8] sm:$0xff]   ;;  %v1102_v38 = vld [vmem:[%s1444_s1 + $0x108] sm:$0xff]  }
   0xc   :  { %971 = vmatprep.subr.bf16.mxu0 %v1075_v12  ;;  %v1090_v27 = vld [vmem:[%s1444_s1 + $0xb0] sm:$0xff]   ;;  %v1096_v32 = vld [vmem:[%s1445_s0 + $0x4] ss:$20 sps:$4 sm:$0xff]   ;;  %v1098_v35 = vld [vmem:[%s1445_s0 + $0x8] ss:$20 sps:$4 sm:$0xff]  }
   0xd   :  { %992 = vmatpush3.bf16.msra.mxu1 %v1074_v11  ;;  %v1094_v31 = vld [vmem:[%s1445_s0] ss:$20 sps:$4 sm:$0xff]   ;;  %v1097_v34 = vld [vmem:[%s1444_s1 + $0xb8] sm:$0xff]   ;;  %413 = vmatprep.mubr.bf16.mxu0 %v1096_v32  ;;  %v1106_v42 = vld [vmem:[%s1444_s1 + $0x128] sm:$0xff]   ;;  %v1404_v11 = vshrl.u32 %v111_v10, 7 }
   0xe   :  { %993 = vmatprep.subr.bf16.mxu1 %v1077_v14  ;;  %v1103_v39 = vld [vmem:[%s1444_s1 + $0x110] sm:$0xff]   ;;  %v1104_v40 = vld [vmem:[%s1444_s1 + $0x118] sm:$0xff]   ;;  %v1105_v41 = vld [vmem:[%s1444_s1 + $0x120] sm:$0xff]  }
   0xf   :  { %972 = vmatpush3.bf16.msra.mxu0 %v1076_v13  ;;  %v1107_v43 = vld [vmem:[%s1444_s1 + $0x130] sm:$0xff]   ;;  %v1108_v44 = vld [vmem:[%s1444_s1 + $0x138] sm:$0xff]   ;;  %v1110_v46 = vld [vmem:[%s1446_s2] ss:$8 sps:$4 sm:$0xff]   ;;  %v113_v12 = vsub.s32 0, %v1404_v11 }
  0x10   :  { %973 = vmatprep.subr.bf16.mxu0 %v1079_v16  ;;  %v1109_v45 = vld [vmem:[%s1445_s0 + $0x10] ss:$20 sps:$4 sm:$0xff]   ;;  %v1115_v48 = vld [vmem:[%s1446_s2 + $0x14] ss:$8 sps:$4 sm:$0xff]   ;;  %v1116_v51 = vld [vmem:[%s1446_s2 + $0x20] ss:$8 sps:$4 sm:$0xff]  }
  0x11   :  { %994 = vmatpush3.bf16.msra.mxu1 %v1078_v15  ;;  %v1112_v47 = vld [vmem:[%s1446_s2 + $0x4] ss:$8 sps:$4 sm:$0xff]   ;;  %v1113_v49 = vld [vmem:[%s1446_s2 + $0x10] ss:$8 sps:$4 sm:$0xff]   ;;  %v1121_v52 = vld [vmem:[%s1446_s2 + $0x34] ss:$8 sps:$4 sm:$0xff]  }
  0x12   :  { %995 = vmatprep.subr.bf16.mxu1 %v1081_v18  ;;  %v1118_v50 = vld [vmem:[%s1446_s2 + $0x24] ss:$8 sps:$4 sm:$0xff]   ;;  %v1119_v53 = vld [vmem:[%s1446_s2 + $0x30] ss:$8 sps:$4 sm:$0xff]   ;;  %v1122_v55 = vld [vmem:[%s1446_s2 + $0x40] ss:$8 sps:$4 sm:$0xff]  }
  0x13   :  { %974 = vmatpush3.bf16.msra.mxu0 %v1080_v17  ;;  %v1124_v54 = vld [vmem:[%s1446_s2 + $0x44] ss:$8 sps:$4 sm:$0xff]   ;;  %v1127_v56 = vld [vmem:[%s1446_s2 + $0x54] ss:$8 sps:$4 sm:$0xff]   ;;  %v1125_v57 = vld [vmem:[%s1446_s2 + $0x50] ss:$8 sps:$4 sm:$0xff]  }
  0x14   :  { %975 = vmatprep.subr.bf16.mxu0 %v1083_v20  ;;  %v1130_v58 = vld [vmem:[%s1446_s2 + $0x64] ss:$8 sps:$4 sm:$0xff]   ;;  %v1128_v59 = vld [vmem:[%s1446_s2 + $0x60] ss:$8 sps:$4 sm:$0xff]   ;;  %v1133_v60 = vld [vmem:[%s1446_s2 + $0x74] ss:$8 sps:$4 sm:$0xff]  }
  0x15   :  { %996 = vmatpush3.bf16.msra.mxu1 %v1082_v19  ;;  %v1131_v61 = vld [vmem:[%s1446_s2 + $0x70] ss:$8 sps:$4 sm:$0xff]   ;;  %v1134_v63 = vld [vmem:[%s1447_s3 + $0x40] sm:$0xff]   ;;  %v1136_v1 = vld [vmem:[%s1447_s3 + $0x48] sm:$0xff]  }
  0x16   :  { %997 = vmatprep.subr.bf16.mxu1 %v1085_v22  ;;  %v1135_v0 = vld [vmem:[%s1447_s3] sm:$0xff]   ;;  %v1137_v2 = vld [vmem:[%s1447_s3 + $0x8] sm:$0xff]   ;;  %v1138_v3 = vld [vmem:[%s1447_s3 + $0x50] sm:$0xff]  }
  0x17   :  { %976 = vmatpush3.bf16.msra.mxu0 %v1084_v21  ;;  %v1139_v4 = vld [vmem:[%s1447_s3 + $0x10] sm:$0xff]   ;;  %v1140_v5 = vld [vmem:[%s1447_s3 + $0x58] sm:$0xff]   ;;  %v1142_v7 = vld [vmem:[%s1447_s3 + $0x60] sm:$0xff]  }
  0x18   :  { %977 = vmatprep.subr.bf16.mxu0 %v1087_v24  ;;  %v1141_v6 = vld [vmem:[%s1447_s3 + $0x18] sm:$0xff]   ;;  %v1143_v8 = vld [vmem:[%s1447_s3 + $0x20] sm:$0xff]   ;;  %v1144_v9 = vld [vmem:[%s1447_s3 + $0x68] sm:$0xff]  }
  0x19   :  { %998 = vmatpush3.bf16.msra.mxu1 %v1086_v23  ;;  %v1410_v13 = vld [vmem:[%s1448_s4] sm:$0xff] }
  0x1a   :  { %999 = vmatprep.subr.bf16.mxu1 %v1089_v26  ;;  %v114_v15 = vrot.slane %v1410_v13, %v113_v12 }
  0x1b   :  { %978 = vmatpush3.bf16.msra.mxu0 %v1088_v25 }
  0x1c   :  { %979 = vmatprep.subr.bf16.mxu0 %v1091_v28 }
  0x1d   :  { %1000 = vmatpush3.bf16.msra.mxu1 %v1090_v27 }
  0x1e   :  { %1001 = vmatprep.subr.bf16.mxu1 %v1093_v30 }
  0x1f   :  { %980 = vmatpush3.bf16.msra.mxu0 %v1092_v29 }
  0x20   :  { %1040 = vmatprep.subr.bf16.mxu0 %v1150_v33 }
  0x21   :  { %1002 = vmatpush3.bf16.msra.mxu1 %v1097_v34 }
  0x22   :  { %414 = vmatmul.mubr.bf16.vlgmr.msra.gmra.mrb[0].mxu0 %v1094_v31  ;;  %627 = vmatprep.subr.bf16.mxu1 %v1112_v47 }
  0x23   :  { %1056 = vmatprep.mubr.msk.bf16.mxu0 %vm1151_vm0, %v1150_v33  ;;  %1041 = vmatpush3.bf16.msra.mxu0 %v1101_v37 }
  0x24   :  { %455 = vmatmul.mubr.bf16.vlgmr.msra.gmra.mrb[0].mxu1 %v1098_v35  ;;  %1042 = vmatprep.subr.bf16.mxu0 %v1150_v33 }
  0x25   :  { %628 = vmatpush1.bf16.msra.mxu1 %v1110_v46  ;;  %659 = vmatprep.mubr.bf16.mxu1 %v1152_v62  ;;  %v508_v46 = vsub.s32 1, %v1404_v11 }
  0x26   :  { %629 = vmatprep.subr.bf16.mxu1 %v1115_v48 }
  0x27   :  { %1043 = vmatpush3.bf16.msra.mxu0 %v1102_v38 }
  0x28   :  { %1044 = vmatprep.subr.bf16.mxu0 %v1150_v33 }
  0x29   :  { %630 = vmatpush1.bf16.msra.mxu1 %v1113_v49 }
  0x2a   :  { %631 = vmatprep.subr.bf16.mxu1 %v1118_v50 }
  0x2b   :  { %1045 = vmatpush3.bf16.msra.mxu0 %v1103_v39 }
  0x2c   :  { %1046 = vmatprep.subr.bf16.mxu0 %v1150_v33 }
  0x2d   :  { %632 = vmatpush1.bf16.msra.mxu1 %v1116_v51 }
  0x2e   :  { %633 = vmatprep.subr.bf16.mxu1 %v1121_v52 }
  0x2f   :  { %1047 = vmatpush3.bf16.msra.mxu0 %v1104_v40  ;;  %v1145_v40 = vld [vmem:[%s1447_s3 + $0x28] sm:$0xff]  }
  0x30   :  { %1048 = vmatprep.subr.bf16.mxu0 %v1150_v33 }
  0x31   :  { %634 = vmatpush1.bf16.msra.mxu1 %v1119_v53 }
  0x32   :  { %635 = vmatprep.subr.bf16.mxu1 %v1124_v54 }
  0x33   :  { %1049 = vmatpush3.bf16.msra.mxu0 %v1105_v41  ;;  %v1146_v41 = vld [vmem:[%s1447_s3 + $0x70] sm:$0xff]  }
  0x34   :  { %1050 = vmatprep.subr.bf16.mxu0 %v1150_v33 }
  0x35   :  { %636 = vmatpush1.bf16.msra.mxu1 %v1122_v55 }
  0x36   :  { %637 = vmatprep.subr.bf16.mxu1 %v1127_v56 }
  0x37   :  { %1051 = vmatpush3.bf16.msra.mxu0 %v1106_v42  ;;  %v1147_v42 = vld [vmem:[%s1447_s3 + $0x30] sm:$0xff]  }
  0x38   :  { %1052 = vmatprep.subr.bf16.mxu0 %v1150_v33 }
  0x39   :  { %638 = vmatpush1.bf16.msra.mxu1 %v1125_v57 }
  0x3a   :  { %639 = vmatprep.subr.bf16.mxu1 %v1130_v58 }
  0x3b   :  { %1053 = vmatpush3.bf16.msra.mxu0 %v1107_v43  ;;  %v1148_v43 = vld [vmem:[%s1447_s3 + $0x78] sm:$0xff]  }
  0x3c   :  { %1054 = vmatprep.subr.bf16.mxu0 %v1150_v33 }
  0x3d   :  { %640 = vmatpush1.bf16.msra.mxu1 %v1128_v59 }
  0x3e   :  { %641 = vmatprep.subr.bf16.mxu1 %v1133_v60 }
  0x3f   :  { %1055 = vmatpush3.bf16.msra.mxu0 %v1108_v44  ;;  %v1149_v44 = vld [vmem:[%s1447_s3 + $0x38] sm:$0xff]  }
  0x40   :  { %1018 = vmatprep.subr.bf16.mxu0 %v1134_v63  ;;  %v710_v63 = vsub.s32 3, %v1404_v11 }
  0x41   :  { %642 = vmatpush1.bf16.msra.mxu1 %v1131_v61 }
  0x42   :  { %1057 = vmatmul.mubr.bf16.vlgmr.msra.gmra.mrb[4].mxu0 %v1109_v45  ;;  %v535_v45 = vld [vmem:[%s1449_s5] sm:$0x3] }
  0x43   :  { %1019 = vmatpush3.bf16.msra.mxu0 %v1135_v0  ;;  %v540_v47 = vrot.slane %v535_v45, %v113_v12  ;;  %v544_v48 = vrot.slane %v535_v45, %v508_v46 }
  0x44   :  { %1020 = vmatprep.subr.bf16.mxu0 %v1136_v1  ;;  %v711_v1 = vrot.slane %v1410_v13, %v710_v63 }
  0x47   :  { %1021 = vmatpush3.bf16.msra.mxu0 %v1137_v2  ;;  %v853_v2 = vsub.s32 4, %v1404_v11 }
  0x48   :  { %1022 = vmatprep.subr.bf16.mxu0 %v1138_v3  ;;  %v514_v3 = vsub.s32 2, %v1404_v11 }
  0x49   :  { %v854_v12 = vrot.slane %v1410_v13, %v853_v2 }
  0x4b   :  { %1023 = vmatpush3.bf16.msra.mxu0 %v1139_v4 }
  0x4c   :  { %1024 = vmatprep.subr.bf16.mxu0 %v1140_v5  ;;  %v509_v5 = vrot.slane %v1410_v13, %v508_v46 }
  0x4f   :  { %1025 = vmatpush3.bf16.msra.mxu0 %v1141_v6 }
  0x50   :  { %1026 = vmatprep.subr.bf16.mxu0 %v1142_v7  ;;  %v859_v7 = vsub.s32 5, %v1404_v11 }
  0x53   :  { %1027 = vmatpush3.bf16.msra.mxu0 %v1143_v8 }
  0x54   :  { %1028 = vmatprep.subr.bf16.mxu0 %v1144_v9 }
  0x57   :  { %1029 = vmatpush3.bf16.msra.mxu0 %v1145_v40 }
  0x58   :  { %1030 = vmatprep.subr.bf16.mxu0 %v1146_v41 }
  0x5b   :  { %1031 = vmatpush3.bf16.msra.mxu0 %v1147_v42 }
  0x5c   :  { %1032 = vmatprep.subr.bf16.mxu0 %v1148_v43 }
  0x5f   :  { %1033 = vmatpush3.bf16.msra.mxu0 %v1149_v44 }
  0xf5   :  { %v981_v14 = vpop.f32.mrb[0].mxu0 }
  0xf6   :  { %v982_v16 = vpop.f32.mrb[1].mxu0 }
  0xf7   :  { %v983_v17 = vadd.f32 %v982_v16, %v981_v14  ;;  %v984_v18 = vpop.f32.mrb[2].mxu0  ;;  %v1003_v19 = vpop.f32.mrb[0].mxu1 }
  0xf8   :  { %v985_v20 = vpop.f32.mrb[3].mxu0  ;;  %v1004_v23 = vpop.f32.mrb[1].mxu1 }
  0xf9   :  { %v416_v21 = vadd.f32 %v983_v17, %v114_v15  ;;  %v986_v22 = vadd.f32 %v985_v20, %v984_v18  ;;  %v1005_v24 = vadd.f32 %v1004_v23, %v1003_v19  ;;  %v1006_v25 = vpop.f32.mrb[2].mxu1  ;;  %v860_v18 = vrot.slane %v1410_v13, %v859_v7 }
  0xfa   :  { %v1007_v27 = vpop.f32.mrb[3].mxu1 }
  0xfb   :  { %v419_v26 = vadd.f32 %v986_v22, %v114_v15  ;;  %v1008_v28 = vadd.f32 %v1007_v27, %v1006_v25  ;;  %v457_v29 = vadd.f32 %v1005_v24, %v416_v21  ;;  %v515_v15 = vrot.slane %v1410_v13, %v514_v3 }
  0xfd   :  { %v460_v30 = vadd.f32 %v1008_v28, %v419_v26 }
 0x115   :  { %v497_v31 = vpop.f32.mrb[4].mxu0 }
 0x116   :  { %v498_v32 = vadd.f32 %v497_v31, %v457_v29  ;;  %v1058_v33 = vpop.f32.mrb[5].mxu0 }
 0x117   :  { %v500_v34 = vpop.f32.mrb[6].mxu0 }
 0x118   :  { %v501_v35 = vadd.f32 %v500_v34, %v460_v30  ;;  %v1059_v36 = vpop.f32.mrb[7].mxu0  ;;  %v504_v37 = vmax.f32 %v498_v32, 0.0 }
 0x11a   :  { %v505_v38 = vmax.f32 %v501_v35, 0.0  ;;  %v510_v16 = vmul.f32 %v509_v5, %v504_v37 }
 0x11c   :  { %v518_v39 = vpack.c.bf16 %v505_v38, %v504_v37  ;;  %v511_v20 = vmul.f32 %v509_v5, %v505_v38  ;;  %v516_v23 = vadd.f32 %v515_v15, %v510_v16 }
 0x11e   :  { %660 = vmatmul.mubr.bf16.vlgmr.msra.gmra.mrb[4].mxu1 %v518_v39  ;;  %v517_v11 = vadd.f32 %v515_v15, %v511_v20 }
 0x1f1   :  { %v661_v49 = vpop.f32.mrb[4].mxu1 }
 0x1f2   :  { %v662_v50 = vadd.f32 %v661_v49, %v540_v47  ;;  %v663_v51 = vpop.f32.mrb[5].mxu1 }
 0x1f3   :  { %v664_v52 = vadd.f32 %v663_v51, %v544_v48  ;;  %v665_v53 = vpop.f32.mrb[6].mxu1 }
 0x1f4   :  { %v666_v54 = vadd.f32 %v665_v53, %v540_v47  ;;  %v667_v55 = vpop.f32.mrb[7].mxu1  ;;  %v670_v57 = vmax.f32 %v662_v50, 0.0 }
 0x1f5   :  { %v668_v56 = vadd.f32 %v667_v55, %v544_v48  ;;  %v671_v59 = vmax.f32 %v664_v52, 0.0 }
 0x1f6   :  { %v672_v58 = vmax.f32 %v666_v54, 0.0 }
 0x1f7   :  { %v673_v60 = vmax.f32 %v668_v56, 0.0 }
 0x1f8   :  { %v674_v61 = vpack.c.bf16 %v672_v58, %v670_v57 }
 0x1f9   :  { %v675_v62 = vpack.c.bf16 %v673_v60, %v671_v59 }
 0x1fb   :  { %840 = vmatprep.mubr.bf16.mxu0 %v675_v62 }
 0x1fc   :  { %841 = vmatmul.mubr.bf16.vlgmr.msra.gmra.mrb[8].mxu0 %v674_v61 }
 0x2cf   :  { %v1034_v0 = vpop.f32.mrb[8].mxu0 }
 0x2d0   :  { %v1035_v4 = vpop.f32.mrb[9].mxu0 }
 0x2d1   :  { %v1036_v6 = vadd.f32 %v1035_v4, %v1034_v0  ;;  %v1037_v8 = vpop.f32.mrb[10].mxu0 }
 0x2d2   :  { %v1038_v9 = vpop.f32.mrb[11].mxu0 }
 0x2d3   :  { %v843_v10 = vadd.f32 %v1036_v6, %v711_v1  ;;  %v1039_v14 = vadd.f32 %v1038_v9, %v1037_v8 }
 0x2d5   :  { %v849_v17 = vmax.f32 %v843_v10, 0.0  ;;  %v846_v19 = vadd.f32 %v1039_v14, %v711_v1 }
 0x2d7   :  { %v855_v21 = vmul.f32 %v854_v12, %v849_v17  ;;  %v850_v22 = vmax.f32 %v846_v19, 0.0 }
 0x2d9   :  { %v861_v24 = vadd.f32 %v860_v18, %v855_v21  ;;  %v856_v25 = vmul.f32 %v854_v12, %v850_v22 }
 0x2db   :  { %v863_v26 = vadd.f32 %v861_v24, %v516_v23  ;;  %v862_v27 = vadd.f32 %v860_v18, %v856_v25 }
 0x2dd   :  { %v864_v28 = vadd.f32 %v862_v27, %v517_v11 }
 0x2df   :  { %v963_v29 = vpack.c.bf16 %v864_v28, %v863_v26 }
 0x2e1   :  { %964 = vst [vmem:[%s1450_s6] sm:$0xff] %v963_v29  }

</bundles_post_ra>
